<compile_context>
chip_gen: v5e
topology: v5e:2x2
jax: 0.10.0
libtpu: 0.0.40
codegen_flags: <defaults>
</compile_context>

<pallas_src>
import numpy as np
import jax
import jax.numpy as jnp
from jax.experimental import pallas as pl
from jax.experimental.pallas import tpu as pltpu


# ----------------------------- fused Pallas kernel -------------------------- #

def club_mi_kernel(flags_ref,                      # SMEM scalar-prefetch: (P,) int32
                   x_ref, y_ref, pm_ref,           # per-pair blocks
                   fcw_ref, fcb_ref,               # fc head (bf16 W, f32 b)
                   w1_ref, b1_ref,                 # fused first layer (D, 4D)
                   w2m_ref, b2m_ref,               # p_mu second layer (4D, D)
                   w2l_ref, b2l_ref,               # p_logvar second layer (4D, D)
                   out_ref):                       # (8, 128) lane-dense slab
    g = pl.program_id(0)
    apply_fc = flags_ref[g].astype(jnp.float32)    # 1.0 -> y = relu(fc(y_raw)), 0.0 -> y = y_raw

    x = x_ref[...]                                 # (N, D) f32
    y_raw = y_ref[...]                             # (N, D) f32 (already tail+rel for fc pairs)
    pmat = pm_ref[...]                             # (N, N) f32 one-hot permutation matrix

    # fc head: relu(y_raw @ Wfc + bfc); blended in arithmetically with the flag.
    fc_y = jnp.maximum(
        jnp.dot(y_raw.astype(jnp.bfloat16), fcw_ref[...],
                preferred_element_type=jnp.float32) + fcb_ref[...], 0.0)
    y = apply_fc * fc_y + (1.0 - apply_fc) * y_raw

    # Fused first layer of p_mu & p_logvar: (N, D) @ (D, 4D) -> lane-dense (N, 128).
    h = jnp.maximum(
        jnp.dot(x.astype(jnp.bfloat16), w1_ref[...],
                preferred_element_type=jnp.float32) + b1_ref[...], 0.0)
    hb = h.astype(jnp.bfloat16)

    # Second layers (weights zero-padded to K=4D so no lane slicing of h is needed).
    mu = jnp.dot(hb, w2m_ref[...], preferred_element_type=jnp.float32) + b2m_ref[...]
    logvar = jnp.tanh(
        jnp.dot(hb, w2l_ref[...], preferred_element_type=jnp.float32) + b2l_ref[...])
    inv_var = jnp.exp(-logvar)

    # y[perm] via one-hot matmul (exact row selection, keeps values in f32).
    yp = jnp.dot(pmat, y, preferred_element_type=jnp.float32)

    d_pos = mu - y
    d_neg = mu - yp
    diff = (d_neg * d_neg - d_pos * d_pos) * inv_var          # (N, D)

    row = jnp.sum(diff, axis=1, keepdims=True)                # (N, 1)
    tot = jnp.sum(row, axis=0, keepdims=True)                 # (1, 1)
    mi = jnp.maximum(tot * 0.25, 0.0)                         # clamp(mi/2, min=0)
    out_ref[...] = jnp.broadcast_to(mi, out_ref.shape)        # lane-dense store


def club_mi_pairs(packed_w, flags, x_pairs, y_pairs, perm_onehot):
    """Run all (kg, behaviour) MI terms in one gridded pallas_call; returns (P,) f32."""
    P, N, D = x_pairs.shape
    H4 = packed_w["w1"].shape[1]                   # 4 * emb_size

    grid_spec = pltpu.PrefetchScalarGridSpec(
        num_scalar_prefetch=1,
        grid=(P,),
        in_specs=[
            # per-pair activation blocks (vary with the grid index)
            pl.BlockSpec((None, N, D), lambda g, flg: (g, 0, 0)),   # x
            pl.BlockSpec((None, N, D), lambda g, flg: (g, 0, 0)),   # y_raw
            pl.BlockSpec((None, N, N), lambda g, flg: (g, 0, 0)),   # one-hot perm
            # weights: constant index_maps -> loaded once, VMEM-resident
            pl.BlockSpec((D, D), lambda g, flg: (0, 0)),            # fc_w
            pl.BlockSpec((1, D), lambda g, flg: (0, 0)),            # fc_b
            pl.BlockSpec((D, H4), lambda g, flg: (0, 0)),           # [mu_w1 | lv_w1]
            pl.BlockSpec((1, H4), lambda g, flg: (0, 0)),           # [mu_b1 | lv_b1]
            pl.BlockSpec((H4, D), lambda g, flg: (0, 0)),           # mu_w2 (zero-padded)
            pl.BlockSpec((1, D), lambda g, flg: (0, 0)),            # mu_b2
            pl.BlockSpec((H4, D), lambda g, flg: (0, 0)),           # lv_w2 (zero-padded)
            pl.BlockSpec((1, D), lambda g, flg: (0, 0)),            # lv_b2
        ],
        out_specs=pl.BlockSpec((None, 8, 128), lambda g, flg: (g, 0, 0)),
    )

    out = pl.pallas_call(
        club_mi_kernel,
        out_shape=jax.ShapeDtypeStruct((P, 8, 128), jnp.float32),
        grid_spec=grid_spec,
        compiler_params=pltpu.CompilerParams(
            dimension_semantics=("parallel",)),     # v7x: shard pairs across 2 TCs
    )(flags, x_pairs, y_pairs, perm_onehot,
      packed_w["fc_w"], packed_w["fc_b"],
      packed_w["w1"], packed_w["b1"],
      packed_w["w2mu"], packed_w["b2mu"],
      packed_w["w2lv"], packed_w["b2lv"])

    return out[:, 0, 0]


# ------------------------------ weight packing ------------------------------- #

def prepare_packed_params(params):
    f32, bf16 = jnp.float32, jnp.bfloat16
    d = params["fc_w"].shape[0]
    h = params["mu_w1"].shape[1]                                   # 2 * emb_size
    w1 = jnp.concatenate([params["mu_w1"], params["lv_w1"]], axis=1)   # (D, 4D)
    b1 = jnp.concatenate([params["mu_b1"], params["lv_b1"]], axis=1)   # (1, 4D)
    z = jnp.zeros((h, d), f32)
    w2mu = jnp.concatenate([params["mu_w2"], z], axis=0)               # (4D, D)
    w2lv = jnp.concatenate([z, params["lv_w2"]], axis=0)               # (4D, D)
    return {
        "fc_w": params["fc_w"].astype(bf16), "fc_b": params["fc_b"].astype(f32),
        "w1": w1.astype(bf16), "b1": b1.astype(f32),
        "w2mu": w2mu.astype(bf16), "b2mu": params["mu_b2"].astype(f32),
        "w2lv": w2lv.astype(bf16), "b2lv": params["lv_b2"].astype(f32),
    }


# ------------------------------ host-side glue ------------------------------- #
# TODO(synk): torch.isin / fancy-index gathering and torch.randperm have no clean Pallas
# equivalent at these data-dependent sizes; they stay as one-time host/XLA glue here.

def pack_inputs(item_emb, batch_items, heads, relations, tails,
                head_embs, relation_embs, tail_embs, behaviors, key, n_pad):
    n_kg = len(head_embs)
    n_beh = len(behaviors) - 1
    d = item_emb[0].shape[1]

    # Loop-invariant index sets: computed once (identical per kg in the reference).
    batch_kg_items = batch_items[np.isin(batch_items, heads)]
    beh_batch = []
    for beh in range(n_beh):
        beh_tails = tails[relations == beh]
        beh_batch.append(batch_items[np.isin(batch_items, beh_tails)])

    def pad_rows(a):
        a = jnp.asarray(a, jnp.float32).reshape(-1, d)
        return jnp.pad(a, ((0, n_pad - a.shape[0]), (0, 0)))

    def make_perm(n_valid, sub):
        p = np.arange(n_pad)
        if n_valid > 1:
            p[:n_valid] = np.asarray(jax.random.permutation(sub, n_valid))
        return jnp.asarray(np.eye(n_pad, dtype=np.float32)[p])   # (N, N) one-hot

    xs, ys, perms, flags = [], [], [], []
    k = key
    for i in range(n_kg):
        # head pair:  calc_mi_est(tar_item_emb, head_emb)
        nv = int(batch_kg_items.size)
        k, sub = jax.random.split(k)
        xs.append(pad_rows(item_emb[-1][batch_kg_items]))
        ys.append(pad_rows(head_embs[i][batch_kg_items]))
        perms.append(make_perm(nv, sub))
        flags.append(0)
        # behaviour pairs: calc_mi_est(aux_item_emb, fc(tail_emb + relation_emb))
        for beh in range(n_beh):
            bt = beh_batch[beh]
            nv = int(bt.size)
            k, sub = jax.random.split(k)
            xs.append(pad_rows(item_emb[beh][bt]))
            ys.append(pad_rows(tail_embs[i][bt] + relation_embs[i][beh][None, :]))
            perms.append(make_perm(nv, sub))
            flags.append(1)

    return (jnp.asarray(flags, jnp.int32),
            jnp.stack(xs), jnp.stack(ys), jnp.stack(perms))


def club_sample_forward(params, item_emb, batch_items,
                        heads, relations, tails,
                        head_embs, relation_embs, tail_embs,
                        behaviors, key):
    """Mirrors CLUBSample.forward with one fused Pallas kernel launch."""
    n_kg = len(head_embs)
    n_pad = max(8, ((int(batch_items.size) + 7) // 8) * 8)   # static padded row count

    flags, x_pairs, y_pairs, perm_onehot = pack_inputs(
        item_emb, batch_items, heads, relations, tails,
        head_embs, relation_embs, tail_embs, behaviors, key, n_pad)
    packed_w = prepare_packed_params(params)

    mi_pairs = club_mi_pairs(packed_w, flags, x_pairs, y_pairs, perm_onehot)  # (P,)
    # Each pair value is already clamped; reference sums per kg then averages over kg.
    return jnp.sum(mi_pairs) / n_kg


def init_params(key, emb_size):
    d = emb_size
    h = 2 * emb_size
    ks = jax.random.split(key, 11)
    scale = 0.1
    return {
        # fc: Linear(D, D) + ReLU
        "fc_w": scale * jax.random.normal(ks[0], (d, d), jnp.float32),
        "fc_b": scale * jax.random.normal(ks[1], (1, d), jnp.float32),
        # p_mu: Linear(D, 2D) -> ReLU -> Linear(2D, D)
        "mu_w1": scale * jax.random.normal(ks[2], (d, h), jnp.float32),
        "mu_b1": scale * jax.random.normal(ks[3], (1, h), jnp.float32),
        "mu_w2": scale * jax.random.normal(ks[4], (h, d), jnp.float32),
        "mu_b2": scale * jax.random.normal(ks[5], (1, d), jnp.float32),
        # p_logvar: Linear(D, 2D) -> ReLU -> Linear(2D, D) -> Tanh
        "lv_w1": scale * jax.random.normal(ks[6], (d, h), jnp.float32),
        "lv_b1": scale * jax.random.normal(ks[7], (1, h), jnp.float32),
        "lv_w2": scale * jax.random.normal(ks[8], (h, d), jnp.float32),
        "lv_b2": scale * jax.random.normal(ks[9], (1, d), jnp.float32),
    }


# ---------------------------------- main ------------------------------------ #

if __name__ == "__main__":
    emb_size = 32            # args.emb_size
    num_items = 40
    num_edges = 30
    batch_size = 16
    behaviors = ["view", "cart", "buy"]   # 3 behaviors -> 2 auxiliary behaviors
    n_kg = 2                              # len(head_embs)

    root = jax.random.PRNGKey(0)
    k_param, k_data, k_fwd = jax.random.split(root, 3)
    params = init_params(k_param, emb_size)

    # Knowledge-graph triples (heads / relations / tails) and batch item ids (glue data).
    rng = np.random.RandomState(0)
    heads = rng.randint(0, num_items, size=(num_edges,)).astype(np.int64)
    relations = rng.randint(0, len(behaviors) - 1, size=(num_edges,)).astype(np.int64)
    tails = rng.randint(0, num_items, size=(num_edges,)).astype(np.int64)
    batch_items = rng.randint(0, num_items, size=(batch_size,)).astype(np.int64)

    # Embedding tables (deterministic, built in-script).
    dkeys = jax.random.split(k_data, 4)
    item_emb = [0.1 * jax.random.normal(kk, (num_items, emb_size), jnp.float32)
                for kk in jax.random.split(dkeys[0], len(behaviors))]
    head_embs = [0.1 * jax.random.normal(kk, (num_items, emb_size), jnp.float32)
                 for kk in jax.random.split(dkeys[1], n_kg)]
    tail_embs = [0.1 * jax.random.normal(kk, (num_items, emb_size), jnp.float32)
                 for kk in jax.random.split(dkeys[2], n_kg)]
    relation_embs = [0.1 * jax.random.normal(kk, (len(behaviors) - 1, emb_size), jnp.float32)
                     for kk in jax.random.split(dkeys[3], n_kg)]

    out = club_sample_forward(params, item_emb, batch_items,
                              heads, relations, tails,
                              head_embs, relation_embs, tail_embs,
                              behaviors, k_fwd)
    out = jax.block_until_ready(out)
    assert jnp.isfinite(out)
    print("KERNEL_OK")
</pallas_src>

<mosaic_0001>
module attributes {stable_mosaic.version = 11 : i64} {
  func.func @club_mi_kernel(%arg0: i32, %arg1: memref<6xi32, #tpu.memory_space<smem>>, %arg2: memref<1x16x32xf32, #tpu.memory_space<vmem>>, %arg3: memref<1x16x32xf32, #tpu.memory_space<vmem>>, %arg4: memref<1x16x16xf32, #tpu.memory_space<vmem>>, %arg5: memref<32x32xbf16, #tpu.memory_space<vmem>>, %arg6: memref<1x32xf32, #tpu.memory_space<vmem>>, %arg7: memref<32x128xbf16, #tpu.memory_space<vmem>>, %arg8: memref<1x128xf32, #tpu.memory_space<vmem>>, %arg9: memref<128x32xbf16, #tpu.memory_space<vmem>>, %arg10: memref<1x32xf32, #tpu.memory_space<vmem>>, %arg11: memref<128x32xbf16, #tpu.memory_space<vmem>>, %arg12: memref<1x32xf32, #tpu.memory_space<vmem>>, %arg13: memref<1x8x128xf32, #tpu.memory_space<vmem>>) attributes {dimension_semantics = [#tpu.dimension_semantics<parallel>], iteration_bounds = array<i64: 6>, scalar_prefetch = 1 : i64, scratch_operands = 0 : i64, tpu.core_type = #tpu.core_type<tc>, window_params = [{transform_indices = @transform_0, window_bounds = array<i64: 1, 16, 32>}, {transform_indices = @transform_1, window_bounds = array<i64: 1, 16, 32>}, {transform_indices = @transform_2, window_bounds = array<i64: 1, 16, 16>}, {pipeline_mode = #tpu.pipeline_mode<synchronous>, transform_indices = @transform_3, window_bounds = array<i64: 32, 32>}, {pipeline_mode = #tpu.pipeline_mode<synchronous>, transform_indices = @transform_4, window_bounds = array<i64: 1, 32>}, {pipeline_mode = #tpu.pipeline_mode<synchronous>, transform_indices = @transform_5, window_bounds = array<i64: 32, 128>}, {pipeline_mode = #tpu.pipeline_mode<synchronous>, transform_indices = @transform_6, window_bounds = array<i64: 1, 128>}, {pipeline_mode = #tpu.pipeline_mode<synchronous>, transform_indices = @transform_7, window_bounds = array<i64: 128, 32>}, {pipeline_mode = #tpu.pipeline_mode<synchronous>, transform_indices = @transform_8, window_bounds = array<i64: 1, 32>}, {pipeline_mode = #tpu.pipeline_mode<synchronous>, transform_indices = @transform_9, window_bounds = array<i64: 128, 32>}, {pipeline_mode = #tpu.pipeline_mode<synchronous>, transform_indices = @transform_10, window_bounds = array<i64: 1, 32>}, {transform_indices = @transform_11, window_bounds = array<i64: 1, 8, 128>}]} {
    %0 = arith.index_cast %arg0 : i32 to index
    %1 = memref.load %arg1[%0] : memref<6xi32, #tpu.memory_space<smem>>
    %2 = arith.sitofp %1 : i32 to f32
    %c0 = arith.constant 0 : index
    %c0_0 = arith.constant 0 : index
    %c0_1 = arith.constant 0 : index
    %3 = vector.load %arg2[%c0, %c0_0, %c0_1] : memref<1x16x32xf32, #tpu.memory_space<vmem>>, vector<1x16x32xf32>
    %4 = vector.shape_cast %3 : vector<1x16x32xf32> to vector<16x32xf32>
    %c0_2 = arith.constant 0 : index
    %c0_3 = arith.constant 0 : index
    %c0_4 = arith.constant 0 : index
    %5 = vector.load %arg3[%c0_2, %c0_3, %c0_4] : memref<1x16x32xf32, #tpu.memory_space<vmem>>, vector<1x16x32xf32>
    %6 = vector.shape_cast %5 : vector<1x16x32xf32> to vector<16x32xf32>
    %c0_5 = arith.constant 0 : index
    %c0_6 = arith.constant 0 : index
    %c0_7 = arith.constant 0 : index
    %7 = vector.load %arg4[%c0_5, %c0_6, %c0_7] : memref<1x16x16xf32, #tpu.memory_space<vmem>>, vector<1x16x16xf32>
    %8 = vector.shape_cast %7 : vector<1x16x16xf32> to vector<16x16xf32>
    %9 = arith.truncf %6 : vector<16x32xf32> to vector<16x32xbf16>
    %c0_8 = arith.constant 0 : index
    %c0_9 = arith.constant 0 : index
    %10 = vector.load %arg5[%c0_8, %c0_9] : memref<32x32xbf16, #tpu.memory_space<vmem>>, vector<32x32xbf16>
    %cst = arith.constant dense<0.000000e+00> : vector<16x32xf32>
    %11 = tpu.matmul %9, %10, %cst {dimension_numbers = #tpu.dot_dimension_numbers<[1], [0], [0], [1], [0, 0, 1, 1], [], []>} : vector<16x32xbf16>, vector<32x32xbf16>, vector<16x32xf32> -> vector<16x32xf32>
    %c0_10 = arith.constant 0 : index
    %c0_11 = arith.constant 0 : index
    %12 = vector.load %arg6[%c0_10, %c0_11] : memref<1x32xf32, #tpu.memory_space<vmem>>, vector<1x32xf32>
    %13 = vector.broadcast %12 : vector<1x32xf32> to vector<16x32xf32>
    %14 = arith.addf %11, %13 : vector<16x32xf32>
    %cst_12 = arith.constant 0.000000e+00 : f32
    %15 = vector.broadcast %cst_12 : f32 to vector<16x32xf32>
    %16 = arith.maximumf %14, %15 : vector<16x32xf32>
    %17 = vector.broadcast %2 : f32 to vector<16x32xf32>
    %18 = arith.mulf %17, %16 : vector<16x32xf32>
    %cst_13 = arith.constant 1.000000e+00 : f32
    %19 = arith.subf %cst_13, %2 : f32
    %20 = vector.broadcast %19 : f32 to vector<16x32xf32>
    %21 = arith.mulf %20, %6 : vector<16x32xf32>
    %22 = arith.addf %18, %21 : vector<16x32xf32>
    %23 = arith.truncf %4 : vector<16x32xf32> to vector<16x32xbf16>
    %c0_14 = arith.constant 0 : index
    %c0_15 = arith.constant 0 : index
    %24 = vector.load %arg7[%c0_14, %c0_15] : memref<32x128xbf16, #tpu.memory_space<vmem>>, vector<32x128xbf16>
    %cst_16 = arith.constant dense<0.000000e+00> : vector<16x128xf32>
    %25 = tpu.matmul %23, %24, %cst_16 {dimension_numbers = #tpu.dot_dimension_numbers<[1], [0], [0], [1], [0, 0, 1, 1], [], []>} : vector<16x32xbf16>, vector<32x128xbf16>, vector<16x128xf32> -> vector<16x128xf32>
    %c0_17 = arith.constant 0 : index
    %c0_18 = arith.constant 0 : index
    %26 = vector.load %arg8[%c0_17, %c0_18] : memref<1x128xf32, #tpu.memory_space<vmem>>, vector<1x128xf32>
    %27 = vector.broadcast %26 : vector<1x128xf32> to vector<16x128xf32>
    %28 = arith.addf %25, %27 : vector<16x128xf32>
    %cst_19 = arith.constant 0.000000e+00 : f32
    %29 = vector.broadcast %cst_19 : f32 to vector<16x128xf32>
    %30 = arith.maximumf %28, %29 : vector<16x128xf32>
    %31 = arith.truncf %30 : vector<16x128xf32> to vector<16x128xbf16>
    %c0_20 = arith.constant 0 : index
    %c0_21 = arith.constant 0 : index
    %32 = vector.load %arg9[%c0_20, %c0_21] : memref<128x32xbf16, #tpu.memory_space<vmem>>, vector<128x32xbf16>
    %cst_22 = arith.constant dense<0.000000e+00> : vector<16x32xf32>
    %33 = tpu.matmul %31, %32, %cst_22 {dimension_numbers = #tpu.dot_dimension_numbers<[1], [0], [0], [1], [0, 0, 1, 1], [], []>} : vector<16x128xbf16>, vector<128x32xbf16>, vector<16x32xf32> -> vector<16x32xf32>
    %c0_23 = arith.constant 0 : index
    %c0_24 = arith.constant 0 : index
    %34 = vector.load %arg10[%c0_23, %c0_24] : memref<1x32xf32, #tpu.memory_space<vmem>>, vector<1x32xf32>
    %35 = vector.broadcast %34 : vector<1x32xf32> to vector<16x32xf32>
    %36 = arith.addf %33, %35 : vector<16x32xf32>
    %c0_25 = arith.constant 0 : index
    %c0_26 = arith.constant 0 : index
    %37 = vector.load %arg11[%c0_25, %c0_26] : memref<128x32xbf16, #tpu.memory_space<vmem>>, vector<128x32xbf16>
    %cst_27 = arith.constant dense<0.000000e+00> : vector<16x32xf32>
    %38 = tpu.matmul %31, %37, %cst_27 {dimension_numbers = #tpu.dot_dimension_numbers<[1], [0], [0], [1], [0, 0, 1, 1], [], []>} : vector<16x128xbf16>, vector<128x32xbf16>, vector<16x32xf32> -> vector<16x32xf32>
    %c0_28 = arith.constant 0 : index
    %c0_29 = arith.constant 0 : index
    %39 = vector.load %arg12[%c0_28, %c0_29] : memref<1x32xf32, #tpu.memory_space<vmem>>, vector<1x32xf32>
    %40 = vector.broadcast %39 : vector<1x32xf32> to vector<16x32xf32>
    %41 = arith.addf %38, %40 : vector<16x32xf32>
    %42 = math.tanh %41 : vector<16x32xf32>
    %cst_30 = arith.constant 0.000000e+00 : f32
    %43 = vector.broadcast %cst_30 : f32 to vector<16x32xf32>
    %44 = arith.subf %43, %42 : vector<16x32xf32>
    %45 = math.exp %44 : vector<16x32xf32>
    %cst_31 = arith.constant dense<0.000000e+00> : vector<16x32xf32>
    %46 = tpu.matmul %8, %22, %cst_31 {dimension_numbers = #tpu.dot_dimension_numbers<[1], [0], [0], [1], [0, 0, 1, 1], [], []>} : vector<16x16xf32>, vector<16x32xf32>, vector<16x32xf32> -> vector<16x32xf32>
    %47 = arith.subf %36, %22 : vector<16x32xf32>
    %48 = arith.subf %36, %46 : vector<16x32xf32>
    %49 = arith.mulf %48, %48 : vector<16x32xf32>
    %50 = arith.mulf %47, %47 : vector<16x32xf32>
    %51 = arith.subf %49, %50 : vector<16x32xf32>
    %52 = arith.mulf %51, %45 : vector<16x32xf32>
    %cst_32 = arith.constant dense<0.000000e+00> : vector<16xf32>
    %53 = vector.multi_reduction <add>, %52, %cst_32 [1] : vector<16x32xf32> to vector<16xf32>
    %54 = vector.shape_cast %53 : vector<16xf32> to vector<16x1xf32>
    %cst_33 = arith.constant dense<0.000000e+00> : vector<1xf32>
    %55 = vector.multi_reduction <add>, %54, %cst_33 [0] : vector<16x1xf32> to vector<1xf32>
    %56 = vector.shape_cast %55 : vector<1xf32> to vector<1x1xf32>
    %cst_34 = arith.constant 2.500000e-01 : f32
    %57 = vector.broadcast %cst_34 : f32 to vector<1x1xf32>
    %58 = arith.mulf %56, %57 : vector<1x1xf32>
    %cst_35 = arith.constant 0.000000e+00 : f32
    %59 = vector.broadcast %cst_35 : f32 to vector<1x1xf32>
    %60 = arith.maximumf %58, %59 : vector<1x1xf32>
    %61 = vector.shape_cast %60 : vector<1x1xf32> to vector<1x1xf32>
    %62 = vector.broadcast %61 : vector<1x1xf32> to vector<8x128xf32>
    %c0_36 = arith.constant 0 : index
    %c0_37 = arith.constant 0 : index
    %c0_38 = arith.constant 0 : index
    %63 = vector.load %arg13[%c0_36, %c0_37, %c0_38] : memref<1x8x128xf32, #tpu.memory_space<vmem>>, vector<1x8x128xf32>
    %64 = vector.shape_cast %63 : vector<1x8x128xf32> to vector<8x128xf32>
    %65 = vector.shape_cast %62 : vector<8x128xf32> to vector<1x8x128xf32>
    tpu.vector_store %arg13[%c0_36, %c0_37, %c0_38], %65 {strides = array<i32>} : memref<1x8x128xf32, #tpu.memory_space<vmem>>, vector<1x8x128xf32>,
    return
  }
  func.func @transform_0(%arg0: i32, %arg1: memref<6xi32, #tpu.memory_space<smem>>) -> (i32, i32, i32) {
    %c0_i32 = arith.constant 0 : i32
    %c0_i32_0 = arith.constant 0 : i32
    %c0_i32_1 = arith.constant 0 : i32
    return %arg0, %c0_i32, %c0_i32_0 : i32, i32, i32
  }
  func.func @transform_1(%arg0: i32, %arg1: memref<6xi32, #tpu.memory_space<smem>>) -> (i32, i32, i32) {
    %c0_i32 = arith.constant 0 : i32
    %c0_i32_0 = arith.constant 0 : i32
    %c0_i32_1 = arith.constant 0 : i32
    return %arg0, %c0_i32, %c0_i32_0 : i32, i32, i32
  }
  func.func @transform_2(%arg0: i32, %arg1: memref<6xi32, #tpu.memory_space<smem>>) -> (i32, i32, i32) {
    %c0_i32 = arith.constant 0 : i32
    %c0_i32_0 = arith.constant 0 : i32
    %c0_i32_1 = arith.constant 0 : i32
    return %arg0, %c0_i32, %c0_i32_0 : i32, i32, i32
  }
  func.func @transform_3(%arg0: i32, %arg1: memref<6xi32, #tpu.memory_space<smem>>) -> (i32, i32) {
    %c0_i32 = arith.constant 0 : i32
    %c0_i32_0 = arith.constant 0 : i32
    %c0_i32_1 = arith.constant 0 : i32
    return %c0_i32, %c0_i32_0 : i32, i32
  }
  func.func @transform_4(%arg0: i32, %arg1: memref<6xi32, #tpu.memory_space<smem>>) -> (i32, i32) {
    %c0_i32 = arith.constant 0 : i32
    %c0_i32_0 = arith.constant 0 : i32
    %c0_i32_1 = arith.constant 0 : i32
    return %c0_i32, %c0_i32_0 : i32, i32
  }
  func.func @transform_5(%arg0: i32, %arg1: memref<6xi32, #tpu.memory_space<smem>>) -> (i32, i32) {
    %c0_i32 = arith.constant 0 : i32
    %c0_i32_0 = arith.constant 0 : i32
    %c0_i32_1 = arith.constant 0 : i32
    return %c0_i32, %c0_i32_0 : i32, i32
  }
  func.func @transform_6(%arg0: i32, %arg1: memref<6xi32, #tpu.memory_space<smem>>) -> (i32, i32) {
    %c0_i32 = arith.constant 0 : i32
    %c0_i32_0 = arith.constant 0 : i32
    %c0_i32_1 = arith.constant 0 : i32
    return %c0_i32, %c0_i32_0 : i32, i32
  }
  func.func @transform_7(%arg0: i32, %arg1: memref<6xi32, #tpu.memory_space<smem>>) -> (i32, i32) {
    %c0_i32 = arith.constant 0 : i32
    %c0_i32_0 = arith.constant 0 : i32
    %c0_i32_1 = arith.constant 0 : i32
    return %c0_i32, %c0_i32_0 : i32, i32
  }
  func.func @transform_8(%arg0: i32, %arg1: memref<6xi32, #tpu.memory_space<smem>>) -> (i32, i32) {
    %c0_i32 = arith.constant 0 : i32
    %c0_i32_0 = arith.constant 0 : i32
    %c0_i32_1 = arith.constant 0 : i32
    return %c0_i32, %c0_i32_0 : i32, i32
  }
  func.func @transform_9(%arg0: i32, %arg1: memref<6xi32, #tpu.memory_space<smem>>) -> (i32, i32) {
    %c0_i32 = arith.constant 0 : i32
    %c0_i32_0 = arith.constant 0 : i32
    %c0_i32_1 = arith.constant 0 : i32
    return %c0_i32, %c0_i32_0 : i32, i32
  }
  func.func @transform_10(%arg0: i32, %arg1: memref<6xi32, #tpu.memory_space<smem>>) -> (i32, i32) {
    %c0_i32 = arith.constant 0 : i32
    %c0_i32_0 = arith.constant 0 : i32
    %c0_i32_1 = arith.constant 0 : i32
    return %c0_i32, %c0_i32_0 : i32, i32
  }
  func.func @transform_11(%arg0: i32, %arg1: memref<6xi32, #tpu.memory_space<smem>>) -> (i32, i32, i32) {
    %c0_i32 = arith.constant 0 : i32
    %c0_i32_0 = arith.constant 0 : i32
    %c0_i32_1 = arith.constant 0 : i32
    return %arg0, %c0_i32, %c0_i32_0 : i32, i32, i32
  }
}

</mosaic_0001>

<bundles_post_ra>
// kernel: tpu_custom_call.1
= control target key start
LH: loop header
LB: loop body
LE: loop exit
PB: predicated region body
PF: predicated region fallthrough
CT: control target
= control target key end

     0   :  { %s1267_s24 = smov [#allocation3]   ;;  %s1591_s0 = inlined_call_operand.vmem [shape: s32[6], index: 0, kind: input, shape index: {}]   ;;  %s1592_s1 = inlined_call_operand.vmem [shape: f32[6,16,32], index: 1, kind: input, shape index: {}]   ;;  %s1593_s2 = inlined_call_operand.hbm [shape: f32[6,16,32], index: 2, kind: input, shape index: {}]   ;;  %s1594_s3 = inlined_call_operand.hbm [shape: f32[6,16,16], index: 3, kind: input, shape index: {}]   ;;  %s1595_s4 = inlined_call_operand.vmem [shape: bf16[32,32], index: 4, kind: input, shape index: {}]   ;;  %s1596_s5 = inlined_call_operand.vmem [shape: f32[1,32], index: 5, kind: input, shape index: {}]   ;;  %s1597_s6 = inlined_call_operand.vmem [shape: bf16[32,128], index: 6, kind: input, shape index: {}]   ;;  %s1598_s7 = inlined_call_operand.vmem [shape: f32[1,128], index: 7, kind: input, shape index: {}]   ;;  %s1599_s8 = inlined_call_operand.vmem [shape: bf16[128,32], index: 8, kind: input, shape index: {}]   ;;  %s1600_s9 = inlined_call_operand.vmem [shape: f32[1,32], index: 9, kind: input, shape index: {}]   ;;  %s1601_s10 = inlined_call_operand.vmem [shape: bf16[128,32], index: 10, kind: input, shape index: {}]   ;;  %s1602_s11 = inlined_call_operand.vmem [shape: f32[1,32], index: 11, kind: input, shape index: {}]   ;;  %s1603_s12 = inlined_call_operand.hbm [shape: f32[6,8,128], index: 12, kind: output, shape index: {}]  }
   0x1   :  { %1614 = sst [smem:[#allocation20_spill]] %s1593_s2  ;;  %s18_s23 = sshll.u32 %s1591_s0, 4  ;;  %s19_s23 = int_to_ptr.vmem [resolvable:$true] %s18_s23 }
   0x2   :  { %1615 = sst [smem:[#allocation21_spill]] %s1600_s9 }
   0x3   :  { %1616 = sst [smem:[#allocation22_spill]] %s1603_s12 }
   0x4   :  { %21 = dma.vmem_to_smem %s19_s23, 16, %s1267_s24, [#allocation2] }
   0x5   :  { %1237 = dma.done.wait [#allocation2], 16 }
   0x6   :  { %1238 = vsyncadd [#allocation2], 4294967280 }
   0x7   :  { %24 = sfence }
   0x8   :  { %25 = vsyncpa [#allocation5], 0 }
   0x9   :  { %27 = vsyncpa [#allocation5 + $0x1], 0 }
   0xa   :  { %28 = vsyncpa [#allocation8], 0 }
   0xb   :  { %30 = vsyncpa [#allocation8 + $0x1], 0 }
   0xc   :  { %31 = vsyncpa [#allocation6], 0 }
   0xd   :  { %33 = vsyncpa [#allocation6 + $0x1], 0  ;;  %s1338_s25 = smov 0   ;;  %s1340_s26 = smov 0  }
   0xe   :  { %s1342_s27 = smov 0   ;;  %s1344_s28 = smov 0  }
   0xf LB: > { %1617 = sst [smem:[#allocation14_spill]] %s1253_s25  ;;  %s1359_s0 = sadd.s32 4294967295, %s1265_s28   ;;  %s1265_s28 = sphi %s1344_s28, %s1637_s28   ;;  %s1261_s27 = sphi %s1342_s27, %s1639_s27   ;;  %s1257_s26 = sphi %s1340_s26, %s1641_s26   ;;  %s1253_s25 = sphi %s1338_s25, %s1640_s25  }
  0x10   : > { %1618 = sst [smem:[#allocation15_spill]] %s1261_s27  ;;  %s929_s29 = sadd.s32 4294967294, %s1265_s28  }
  0x11   : > { %s1363_s30 = sadd.s32 1, %s1265_s28   ;;  %s72_s13 = sadd.s32 1, %s1261_s27 }
  0x12   : > { %1619 = sst [smem:[#allocation16_spill]] %s1363_s30  ;;  %s69_s14 = ssub.s32 %s1265_s28, %s1363_s30 }
  0x13   : > { %p79_p0 = scmp.ne.s32.totalorder %s1261_s27, %s1257_s26  ;;  %p70_p1 = scmp.eq.s32.totalorder %s69_s14, 0 }
  0x14   : > { %p80_p2 = scmp.eq.s32.totalorder %s1265_s28, 0  ;;  %p85_p3 = scmp.ne.s32.totalorder %s1257_s26, %s1253_s25 }
  0x15   : > { %p86_p4 = scmp.eq.s32.totalorder %s1359_s0, 0  ;;  %p303_p7 = scmp.eq.s32.totalorder %s1359_s0, 5 }
  0x16   : > { %s1375_s15 = scalar_select %p70_p1, %s1261_s27, %s72_s13  }
  0x17   : > { %p1377_p5 = por %p80_p2, %p79_p0  ;;  %p1381_p6 = por %p86_p4, %p85_p3 }
  0x18   : > { %1620 = sst [smem:[#allocation17_spill]] %s1375_s15  ;;  %p309_p8 = scmp.eq.s32.totalorder %s929_s29, 5 }
  0x19   : > { %p1072_p9 = scmp.lt.s32.totalorder %s1265_s28, 6  ;;  %p1387_p10 = por %p303_p7, %p79_p0 }
  0x1a   : > { %p1391_p11 = por %p309_p8, %p85_p3  ;;  %s1396_s20 = sand.u32 1, %s1261_s27  }
  0x1b   : > { %s1623_s18 = scalar_select %p1387_p10, 1, 0 }
  0x1c   : > { %s1625_s19 = scalar_select %p1391_p11, 1, 0 }
  0x1d   : > { %1624 = sst [smem:[#allocation18_spill]] %s1623_s18  ;;  %s1609_s21 = sshll.u32 %s1265_s28, 4 }
  0x1e   : > { %1626 = sst [smem:[#allocation19_spill]] %s1625_s19  ;;  %s1608_s22 = sshll.u32 %s1396_s20, 4 }
  0x1f   : > { %s1627_s2 = sld [smem:[#allocation20_spill]]  ;;  %s365_s14 = scalar_lea.vmem [#allocation4], %s1608_s22 }
  0x20   : > { %s373_s15 = sshll.u32 %s365_s14, 4  ;;  %p1409_p12 = pnand %p1072_p9, %p1377_p5  ;;  %s374_s15 = int_to_ptr.vmem [resolvable:$true] %s373_s15 }
  0x21   : > { %p938_p13 = scmp.ge.s32.totalorder %s1265_s28, 1  ;;  %p403_p0 = scmp.lt.s32.totalorder %s1265_s28, 7 }
  0x22   : > { %s362_s30 = scalar_lea.sflag [#allocation5], %s1396_s20  ;;  %p1137_p2 = pneg %p1409_p12 }
  0x25   : > { %s370_s29 = scalar_lea.hbm %s1627_s2, %s1609_s21 }
  0x26   : > { %s371_s13 = sshll.u32 %s370_s29, 4  ;;  %s1140_s29 = scalar_lea.hbm %s1627_s2, 96  ;;  %s372_s13 = int_to_ptr.hbm [resolvable:$true] %s371_s13 }
  0x27   : > { %s1133_s19 = sshra.s32 %s372_s13, 4  ;;  %s1134_s19 = int_to_ptr.hbm [resolvable:$true] %s1133_s19 }
  0x28   : > { %s1135_s23 = scalar_lea.hbm %s1134_s19, 16  ;;  %p1141_p5 = scmp.lt.s32.totalorder %s1134_s19, %s1627_s2 }
  0x29   : > { %p1136_p1 = scmp.ne.s32.totalorder %s1134_s19, %s1135_s23  ;;  %p1142_p7 = scmp.lt.s32.totalorder %s1140_s29, %s1135_s23 }
  0x2b   : > { %p1138_p3 = pnand %p1137_p2, %p1136_p1  ;;  %p1143_p8 = por %p1142_p7, %p1141_p5 }
  0x2d   : > { %p1139_p4 = pneg %p1138_p3 }
  0x2f   : > { %p1144_p9 = pnand %p1143_p8, %p1139_p4 }
  0x31   : > { %1147 = shalt.err (!%p1144_p9)
}
  0x32   : > { %s1268_s21 = smov 128   ;;  %s1269_s25 = smov 8  }
  0x33   : > { %1064 = dma.hbm_to_vmem [thread:$0]  (!%p1409_p12), %s372_s13, 256, %s374_s15, %s362_s30, %s1268_s21, %s1268_s21, %s1269_s25  }
  0x34   : > { %p1433_p1 = pnand %p938_p13, %p403_p0  ;;  %s1630_s19 = sshll.u32 %s1265_s28, 4 }
  0x35   : > { %s392_s24 = scalar_lea.hbm %s1594_s3, %s1630_s19  ;;  %s1631_s14 = sshll.u32 %s1396_s20, 4 }
  0x36   : > { %s393_s29 = sshll.u32 %s392_s24, 4  ;;  %s387_s2 = scalar_lea.vmem [#allocation7], %s1631_s14  ;;  %s394_s29 = int_to_ptr.hbm [resolvable:$true] %s393_s29 }
  0x37   : > { %s395_s18 = sshll.u32 %s387_s2, 4  ;;  %s384_s12 = scalar_lea.sflag [#allocation8], %s1396_s20  ;;  %s396_s18 = int_to_ptr.vmem [resolvable:$true] %s395_s18 }
  0x38   : > { %s1163_s9 = sshra.s32 %s394_s29, 4  ;;  %s1170_s23 = scalar_lea.hbm %s1594_s3, 96  ;;  %s1164_s9 = int_to_ptr.hbm [resolvable:$true] %s1163_s9 }
  0x39   : > { %s1165_s30 = scalar_lea.hbm %s1164_s9, 16  ;;  %p1171_p4 = scmp.lt.s32.totalorder %s1164_s9, %s1594_s3 }
  0x3a   : > { %p1166_p3 = scmp.ne.s32.totalorder %s1164_s9, %s1165_s30  ;;  %p1172_p5 = scmp.lt.s32.totalorder %s1170_s23, %s1165_s30 }
  0x3c   : > { %p1168_p13 = pnand %p1166_p3, %p1137_p2  ;;  %p1173_p7 = por %p1172_p5, %p1171_p4 }
  0x3e   : > { %p1169_p0 = pneg %p1168_p13 }
  0x40   : > { %p1174_p8 = pnand %p1173_p7, %p1169_p0 }
  0x42   : > { %1177 = shalt.err (!%p1174_p8)
}
  0x43   : > { %1067 = dma.hbm_to_vmem [thread:$0]  (!%p1409_p12), %s394_s29, 256, %s396_s18, %s384_s12, %s1268_s21, %s1268_s21, %s1269_s25  }
  0x44   : > { %407 = sbr.rel (%p1433_p1) target bundleno = 525 (0x20d), region = 64  ;;  %s1459_s2 = sand.u32 (!%p1433_p1), 1, %s1257_s26  }
  0x45   : > { %s939_s20 = sshll.u32 (!%p1433_p1), %s1459_s2, 4  ;;  %s410_s24 = scalar_lea.sflag (!%p1433_p1), [#allocation5], %s1459_s2 }
  0x46   : > { %s413_s14 = scalar_lea.vmem (!%p1433_p1), [#allocation4], %s939_s20 }
  0x49   : > { %1240 = dma.done.wait (%p1381_p6), %s410_s24, 256  }
  0x4a   : > { %1242 = vsyncadd (%p1381_p6), %s410_s24, 4294967040  ;;  %s420_s9 = scalar_lea.sflag [#allocation8], %s1459_s2  ;;  %s1468_s12 = scalar_lea.vmem [#allocation7], %s939_s20 }
  0x4b   : > { %1244 = dma.done.wait (%p1381_p6), %s420_s9, 256  }
  0x4c   : > { %1246 = vsyncadd (%p1381_p6), %s420_s9, 4294967040  ;;  %p473_p12 = scmp.lt.s32.totalorder %s1359_s0, 5  ;;  %v1036_v0 = vld [vmem:[%s1595_s4 + $0x8] sm:$0xff]  ;;  %v1035_v2 = vld [vmem:[%s1595_s4] sm:$0xff]  ;;  %vm508_vm0 = vcmask 261120   ;;  %s479_s19 = sld [smem:[#allocation3 + %s1359_s0]] }
  0x4d   : > { %v1038_v1 = vld [vmem:[%s1597_s6 + $0x8] sm:$0xff]  ;;  %v1037_v3 = vld [vmem:[%s1597_s6] sm:$0xff]  ;;  %518 = vmatpush.bf16.msra.mxu0 %v1036_v0  ;;  %v1046_v8 = vld [vmem:[%s1599_s8 + $0x38] sm:$0xff]  ;;  %vm750_vm1 = vcmask 130048   ;;  %s1632_s29 = sld [smem:[#allocation21_spill]]  ;;  %s1029_s30 = sshll.u32 %s1359_s0, 3 }
  0x4e   : > { %s474_s25 = scalar_select %p473_p12, %s1359_s0, 5  ;;  %v483_v4 = vld [vmem:[%s413_s14] sm:$0xff]  ;;  %v484_v5 = vld [vmem:[%s413_s14 + $0x8] sm:$0xff]  ;;  %567 = vmatpush.bf16.msra.mxu1 %v1038_v1  ;;  %646 = vmatpush.bf16.msra.mxu2 %v1046_v8 }
  0x4f   : > { %v1054_v9 = vld [vmem:[%s1601_s10 + $0x38] sm:$0xff]  ;;  %v1045_v10 = vld [vmem:[%s1599_s8 + $0x30] sm:$0xff]  ;;  %v487_v11 = vpack.c.bf16 %v484_v5, %v483_v4  ;;  %v1044_v14 = vld [vmem:[%s1599_s8 + $0x28] sm:$0xff]  ;;  %s1633_s23 = sld [smem:[#allocation22_spill]]  ;;  %s809_s9 = scalar_lea.sflag [#allocation6], %s1459_s2 }
  0x50   : > { %s1034_s27 = sshll.u32 %s474_s25, 4  ;;  %728 = vmatpush.bf16.msra.mxu3 %v1054_v9  ;;  %v1053_v13 = vld [vmem:[%s1601_s10 + $0x30] sm:$0xff]  ;;  %v1052_v15 = vld [vmem:[%s1601_s10 + $0x28] sm:$0xff]  ;;  %v1043_v16 = vld [vmem:[%s1599_s8 + $0x20] sm:$0xff] }
  0x51   : > { %s477_s22 = scalar_lea.vmem %s1592_s1, %s1034_s27  ;;  %519 = vmatpush.bf16.msra.mxu0 %v1035_v2  ;;  %v1051_v17 = vld [vmem:[%s1601_s10 + $0x20] sm:$0xff]  ;;  %v1042_v18 = vld [vmem:[%s1599_s8 + $0x18] sm:$0xff]  ;;  %v1041_v20 = vld [vmem:[%s1599_s8 + $0x10] sm:$0xff] }
  0x52   : > { %v481_v6 = vld [vmem:[%s477_s22] sm:$0xff]  ;;  %v482_v7 = vld [vmem:[%s477_s22 + $0x8] sm:$0xff]  ;;  %568 = vmatpush.bf16.msra.mxu1 %v1037_v3  ;;  %647 = vmatpush.bf16.msra.mxu2 %v1045_v10  ;;  %v1050_v19 = vld [vmem:[%s1601_s10 + $0x18] sm:$0xff]  ;;  %s480_s16 = scvt.s32.f32 %s479_s19 }
  0x53   : > { %v537_v12 = vpack.c.bf16 %v482_v7, %v481_v6  ;;  %v1049_v21 = vld [vmem:[%s1601_s10 + $0x10] sm:$0xff]  ;;  %v1040_v22 = vld [vmem:[%s1599_s8 + $0x8] sm:$0xff]  ;;  %v1039_v24 = vld [vmem:[%s1599_s8] sm:$0xff] }
  0x54   : > { %952 = vmatmul.msk.bf16.vlgmr.msra.gmra.mxu0 %vm508_vm0, %v487_v11  ;;  %729 = vmatpush.bf16.msra.mxu3 %v1053_v13  ;;  %v1048_v23 = vld [vmem:[%s1601_s10 + $0x8] sm:$0xff]  ;;  %v1047_v25 = vld [vmem:[%s1601_s10] sm:$0xff]  ;;  %s531_s27 = ssub.f32 1.0, %s480_s16  ;;  %v528_v38 = vstv %s480_s16 }
  0x55   : > { %961 = vmatmul.msk.bf16.vlgmr.msra.gmra.mxu1 %vm508_vm0, %v537_v12  ;;  %v1109_v28 = vld [vmem:[%s1596_s5] ss:$0 sm:$0xff]  ;;  %v486_v50 = vld [vmem:[%s1468_s12 + $0x8] sm:$0xff]  ;;  %s819_s19 = scalar_lea.hbm %s1633_s23, %s1029_s30  ;;  %s1213_s14 = scalar_lea.hbm %s1633_s23, 48 }
  0x56   : > { %648 = vmatpush.bf16.msra.mxu2 %v1044_v14  ;;  %v1110_v30 = vld [vmem:[%s1598_s7] ss:$0 sm:$0xff]  ;;  %v532_v33 = vstv %s531_s27  ;;  %s823_s24 = sshll.u32 %s819_s19, 4  ;;  %s824_s24 = int_to_ptr.hbm [resolvable:$true] %s823_s24 }
  0x57   : > { %v534_v39 = vmul.f32 %v532_v33, %v484_v5  ;;  %v533_v40 = vmul.f32 %v532_v33, %v483_v4  ;;  %v485_v49 = vld [vmem:[%s1468_s12] sm:$0xff]  ;;  %s941_s12 = sshll.u32 %s1459_s2, 3  ;;  %s1207_s25 = sshra.s32 %s824_s24, 4  ;;  %s1208_s25 = int_to_ptr.hbm [resolvable:$true] %s1207_s25 }
  0x58   : > { %730 = vmatpush.bf16.msra.mxu3 %v1052_v15  ;;  %v1112_v51 = vld [vmem:[%s1602_s11] ss:$0 sm:$0xff]  ;;  %s472_s16 = scalar_lea.vmem [#allocation9], %s941_s12  ;;  %s1209_s0 = scalar_lea.hbm %s1208_s25, 8 }
  0x59   : > { %v1111_v55 = vld [vmem:[%s1632_s29] ss:$0 sm:$0xff]  ;;  %s821_s20 = sshll.u32 %s472_s16, 4  ;;  %p1210_p6 = scmp.ne.s32.totalorder %s1208_s25, %s1209_s0  ;;  %s822_s20 = int_to_ptr.vmem [resolvable:$true] %s821_s20 }
  0x5a   : > { %649 = vmatpush.bf16.msra.mxu2 %v1043_v16  ;;  %p1214_p1 = scmp.lt.s32.totalorder %s1208_s25, %s1633_s23  ;;  %p1215_p3 = scmp.lt.s32.totalorder %s1213_s14, %s1209_s0 }
  0x5b   : > { %p1211_p2 = pnand %p1210_p6, %p1387_p10 }
  0x5c   : > { %731 = vmatpush.bf16.msra.mxu3 %v1051_v17  ;;  %p1216_p13 = por %p1215_p3, %p1214_p1 }
  0x5d   : > { %p1212_p9 = pneg %p1211_p2 }
  0x5e   : > { %650 = vmatpush.bf16.msra.mxu2 %v1042_v18 }
  0x5f   : > { %p1217_p0 = pnand %p1216_p13, %p1212_p9 }
  0x60   : > { %732 = vmatpush.bf16.msra.mxu3 %v1050_v19 }
  0x62   : > { %651 = vmatpush.bf16.msra.mxu2 %v1041_v20 }
  0x64   : > { %733 = vmatpush.bf16.msra.mxu3 %v1049_v21 }
  0x66   : > { %652 = vmatpush.bf16.msra.mxu2 %v1040_v22 }
  0x68   : > { %734 = vmatpush.bf16.msra.mxu3 %v1048_v23 }
  0x6a   : > { %653 = vmatpush.bf16.msra.mxu2 %v1039_v24 }
  0x6c   : > { %735 = vmatpush.bf16.msra.mxu3 %v1047_v25 }
  0xd1   : > { %v521_v26 = vpop.f32.mrf.mxu0 }
  0xd2   : > { %v570_v27 = vpop.f32.mrf.mxu1  ;;  %v522_v29 = vadd.f32 %v1109_v28, %v521_v26 }
  0xd3   : > { %v571_v32 = vadd.f32 %v1110_v30, %v570_v27 }
  0xd4   : > { %v526_v31 = vmax.f32 %v522_v29, 0.0 }
  0xd5   : > { %v575_v42 = vmax.f32 %v571_v32, 0.0 }
  0xd6   : > { %v529_v41 = vmul.f32 %v528_v38, %v526_v31 }
  0xd8   : > { %v535_v48 = vadd.f32 %v533_v40, %v529_v41 }
  0xd9   : > { %v523_v34 = vpop.f32.mrf.mxu0 }
  0xda   : > { %v572_v35 = vpop.f32.mrf.mxu1  ;;  %v524_v36 = vadd.f32 %v1109_v28, %v523_v34 }
  0xdb   : > { %v573_v37 = vadd.f32 %v1110_v30, %v572_v35 }
  0xdc   : > { %v527_v43 = vmax.f32 %v524_v36, 0.0 }
  0xdd   : > { %v576_v44 = vmax.f32 %v573_v37, 0.0 }
  0xde   : > { %v530_v45 = vmul.f32 %v528_v38, %v527_v43 }
  0xdf   : > { %v577_v46 = vpack.c.bf16 %v576_v44, %v575_v42 }
  0xe0   : > { %v536_v47 = vadd.f32 %v534_v39, %v530_v45 }
  0xe1   : > { %654 = vmatmul.bf16.vlgmr.msra.gmra.mxu2 %v577_v46  ;;  %736 = vmatmul.bf16.vlgmr.msra.gmra.mxu3 %v577_v46 }
  0xe2   : > { %771 = vmatpush.msrb.mxu0 %v536_v47 }
  0xe4   : > { %772 = vmatpush.msrb.mxu0 %v535_v48 }
  0xe5   : > { %1026 = vmatmul.msk.f32.vlgmr.msrb.gmra.mxu0 %vm750_vm1, %v485_v49 }
  0xed   : > { %1027 = vmatmul.msk.f32.gmra.mxu0 %vm750_vm1, %v486_v50 }
 0x162   : > { %v774_v56 = vpop.f32.mrf.mxu0 }
 0x164   : > { %v737_v52 = vpop.f32.mrf.mxu3  ;;  %v655_v54 = vpop.f32.mrf.mxu2 }
 0x165   : > { %v738_v53 = vadd.f32 %v1112_v51, %v737_v52  ;;  %v656_v57 = vadd.f32 %v1111_v55, %v655_v54 }
 0x167   : > { %1113 = vtanh.f32 %v738_v53  ;;  %v780_v62 = vsub.f32 %v656_v57, %v535_v48  ;;  %v782_v63 = vsub.f32 %v656_v57, %v774_v56 }
 0x169   : > { %v786_v2 = vmul.f32 %v780_v62, %v780_v62  ;;  %v784_v3 = vmul.f32 %v782_v63, %v782_v63 }
 0x16a   : > { %v777_v5 = vpop.f32.mrf.mxu0 }
 0x16b   : > { %v788_v8 = vsub.f32 %v784_v3, %v786_v2 }
 0x16c   : > { %v739_v58 = vpop.f32.mrf.mxu3  ;;  %v657_v1 = vpop.f32.mrf.mxu2 }
 0x16d   : > { %v1114_v59 = vpop.eup %1113  ;;  %v740_v60 = vadd.f32 %v1112_v51, %v739_v58  ;;  %v658_v4 = vadd.f32 %v1111_v55, %v657_v1 }
 0x16e   : > { %v744_v61 = vsub.f32 0.0, %v1114_v59 }
 0x16f   : > { %1115 = vtanh.f32 %v740_v60  ;;  %v781_v9 = vsub.f32 %v658_v4, %v536_v47  ;;  %v783_v10 = vsub.f32 %v658_v4, %v777_v5 }
 0x170   : > { %v746_v0 = vmul.f32 1.442695, %v744_v61 }
 0x171   : > { %v787_v14 = vmul.f32 %v781_v9, %v781_v9  ;;  %v785_v15 = vmul.f32 %v783_v10, %v783_v10 }
 0x172   : > { %1117 = vpow2.f32 %v746_v0 }
 0x173   : > { %v789_v17 = vsub.f32 %v785_v15, %v787_v14 }
 0x175   : > { %v1116_v6 = vpop.eup %1115 }
 0x176   : > { %v745_v7 = vsub.f32 0.0, %v1116_v6 }
 0x178   : > { %v1118_v11 = vpop.eup %1117  ;;  %v748_v12 = vmul.f32 1.442695, %v745_v7 }
 0x179   : > { %v790_v13 = vmul.f32 %v1118_v11, %v788_v8 }
 0x17a   : > { %1119 = vpow2.f32 %v748_v12 }
 0x17b   : > { %v792_v16 = vsel %vm508_vm0, %v790_v13, 0.0 }
 0x17c   : > { %793 = vadd.xlane.f32.xlu0 %v792_v16 }
 0x180   : > { %v1120_v18 = vpop.eup %1119 }
 0x181   : > { %v791_v19 = vmul.f32 %v1120_v18, %v789_v17 }
 0x183   : > { %v795_v20 = vsel %vm508_vm0, %v791_v19, 0.0 }
 0x184   : > { %796 = vadd.xlane.f32.xlu0 %v795_v20 }
 0x1ef   : > { %v794_v21 = vpop.xlane.xlu0 %793 }
 0x1f7   : > { %v797_v22 = vpop.xlane.xlu0 %796 }
 0x1f8   : > { %v798_v23 = vadd.f32 %v797_v22, %v794_v21 }
 0x1fa   : > { %v799_v24 = vrot.slane %v798_v23, 4 }
 0x1fc   : > { %v800_v25 = vadd.f32 %v799_v24, %v798_v23 }
 0x1fe   : > { %v801_v26 = vrot.slane %v800_v25, 2 }
 0x200   : > { %v802_v27 = vadd.f32 %v801_v26, %v800_v25 }
 0x202   : > { %v803_v28 = vrot.slane %v802_v27, 1 }
 0x204   : > { %v804_v29 = vadd.f32 %v803_v28, %v802_v27 }
 0x206   : > { %v805_v30 = vmul.f32 0.25, %v804_v29 }
 0x208   : > { %v806_v31 = vmax.f32 %v805_v30, 0.0 }
 0x20a   : > { %807 = vst [vmem:[%s472_s16] sm:$0xff] %v806_v31 }
 0x20b   : > { %1220 = shalt.err (!%p1217_p0)
}
 0x20c   : > { %1059 = dma.vmem_to_hbm [thread:$0]  (%p1387_p10), %s822_s20, 128, %s824_s24, %s809_s9  }
 0x20d PF: > { %s1635_s2 = sld [smem:[#allocation14_spill]]  ;;  %p1073_p4 = scmp.ge.s32.totalorder %s1265_s28, 2 }
 0x20f   : > { %p1069_p5 = pnand %p1073_p4, %p1391_p11 }
 0x211   : > { %p1070_p7 = pneg %p1069_p5 }
 0x213   : > { %s835_s12 = sand.u32 1, %s1635_s2  }
 0x214   : > { %s836_s30 = scalar_lea.sflag [#allocation6], %s835_s12 }
 0x215   : > { %1248 = dma.done.wait (%p1070_p7), %s836_s30, 128  }
 0x216   : > { %1250 = vsyncadd (%p1070_p7), %s836_s30, 4294967168  ;;  %s1637_s28 = sld [smem:[#allocation16_spill]]  ;;  %s1640_s25 = smov %s1257_s26 }
 0x217   : > { %s1638_s15 = sld [smem:[#allocation15_spill]] }
 0x218   : > { %s1639_s27 = sld [smem:[#allocation17_spill]] }
 0x21c   : > { %p36_p8 = scmp.ge.s32.totalorder %s1637_s28, 8  }
 0x21d   : > { %s1641_s26 = smov %s1638_s15 }
 0x21e   :  { %38 = sbr.rel (!%p36_p8) target bundleno = 15 (0xf), region = 125 }
 0x223   :  { %842 = vsyncpa [#allocation5], 1 }
 0x224   :  { %844 = vsyncpa [#allocation5 + $0x1], 1 }
 0x225   :  { %845 = vsyncpa [#allocation8], 1 }
 0x226   :  { %847 = vsyncpa [#allocation8 + $0x1], 1 }
 0x227   :  { %848 = vsyncpa [#allocation6], 1 }
 0x228   :  { %850 = vsyncpa [#allocation6 + $0x1], 1 }

</bundles_post_ra>
